<compile_context>
chip_gen: v7x
topology: tpu7x:2x2x1
jax: 0.10.0
libtpu: 0.0.40
codegen_flags: <defaults>
</compile_context>

<pallas_src>
import functools
import math

import numpy as np
import jax
import jax.numpy as jnp
from jax.experimental import pallas as pl
from jax.experimental.pallas import tpu as pltpu

EMBED_DIM = 64            # embedding_dim
SENTENCE_LEN = 64         # sentence_len
SCALE = 2.0 * math.pi     # default scale when is_normalize=True
PACK = 2                  # coordinates packed per 128-lane output row
OUT_W = PACK * EMBED_DIM  # 128 — lane-dense output width


def _freq_64_np():
    # freq[2i] = freq[2i+1] = 10000^(2i/EMBED_DIM)  (the torch buffer)
    pair = np.arange(EMBED_DIM) // 2
    return (10000.0 ** (2.0 * pair.astype(np.float64) / EMBED_DIM)).astype(np.float32)


_FREQ_64 = _freq_64_np()


def _pos_table_np():
    # table[q, 2i]   = sin((q/63*2pi) / 10000^(2i/64))
    # table[q, 2i+1] = cos((q/63*2pi) / 10000^(2i/64))
    pos = np.arange(SENTENCE_LEN, dtype=np.float64)[:, None]            # (64,1)
    pair = (np.arange(EMBED_DIM) // 2).astype(np.float64)[None, :]      # (1,64)
    freq = 10000.0 ** (2.0 * pair / EMBED_DIM)
    ang = (pos / (SENTENCE_LEN - 1) * SCALE) / freq                     # (64,64)
    even = (np.arange(EMBED_DIM) % 2 == 0)[None, :]
    return np.where(even, np.sin(ang), np.cos(ang)).astype(np.float32)


def _block_diag_tables_np():
    # (128,128) block-diagonal f32 table, split into two exact bf16 planes:
    #   hi = bf16(table);  lo = bf16(table - hi)
    # One-hot bf16 matmuls against hi and lo are each exact (single selected
    # row, 0/1 weights, f32 accumulation), so hi+lo recovers the f32 table to
    # ~2^-16 relative error — well inside the 1e-5 comparison tolerance.
    tab = _pos_table_np()
    bd = np.zeros((OUT_W, OUT_W), dtype=np.float32)
    bd[:EMBED_DIM, :EMBED_DIM] = tab
    bd[EMBED_DIM:, EMBED_DIM:] = tab
    hi = bd.astype(jnp.bfloat16)                       # ml_dtypes bf16 numpy dtype
    lo = (bd - hi.astype(np.float32)).astype(jnp.bfloat16)
    return hi, lo


_BD_HI_NP, _BD_LO_NP = _block_diag_tables_np()


@functools.lru_cache(maxsize=1)
def _tables():
    return jnp.asarray(_BD_HI_NP), jnp.asarray(_BD_LO_NP)


def _pos_enc_kernel(x_ref, hi_ref, lo_ref, o_ref):
    # x_ref : (TILE, 2)   f32  — two roi coordinates per packed output row
    # hi_ref: (128, 128)  bf16 — block-diag sin/cos table, high bf16 plane
    # lo_ref: (128, 128)  bf16 — residual plane (table - hi)
    # o_ref : (TILE, 128) f32  — two 64-dim encodings per row, lane-dense
    x = x_ref[...]

    # q = clamp(trunc(roi) // 16, 0, 63).  Multiplying by 2^-4 is exact in
    # fp, so floor(x * 0.0625) == trunc(x) // 16 for x >= 0; the clamp makes
    # the x < 0 and x >= 1024 cases agree with the torch int path too.
    q = jnp.clip(jnp.floor(x * 0.0625), 0.0, float(SENTENCE_LEN - 1)).astype(jnp.int32)

    rows = x.shape[0]
    col = jax.lax.broadcasted_iota(jnp.int32, (rows, OUT_W), 1)
    # One-hot row selector for the block-diagonal table:
    #   lanes [0,64)   hit at col == q0          (q0 <= 63: never the top half)
    #   lanes [64,128) hit at col == q1 + 64
    hit = jnp.logical_or(col == q[:, 0:1], col == q[:, 1:2] + EMBED_DIM)
    onehot = jnp.where(hit, 1.0, 0.0).astype(jnp.bfloat16)          # exact 0/1

    # Table lookup as MXU matmuls (moves the work off the VALU entirely).
    res = jnp.dot(onehot, hi_ref[...], preferred_element_type=jnp.float32)
    res = res + jnp.dot(onehot, lo_ref[...], preferred_element_type=jnp.float32)
    o_ref[...] = res


def _pos_enc_jax(relative_roi):
    # Pure-JAX mirror of the PyTorch forward (is_normalize=True).  Used both as
    # the correctness reference and as the small-input fast path.
    N, NUM_CO = relative_roi.shape[:2]
    x = relative_roi.reshape(-1, 4).astype(jnp.int32)
    x = jnp.clip(jnp.floor_divide(x, 16), 0, SENTENCE_LEN - 1)
    v = x.astype(jnp.float32) / float(SENTENCE_LEN - 1) * SCALE
    v = v.reshape(-1, 1)
    ang = v / jnp.asarray(_FREQ_64).reshape(1, EMBED_DIM)
    ans = jnp.stack(
        [jnp.sin(ang[:, 0::2]), jnp.cos(ang[:, 1::2])], axis=2
    ).reshape(ang.shape[0], -1)
    return ans.reshape(N, NUM_CO, -1)


def positional_encoding(relative_roi, *, tile_rows=2048, min_pallas_coords=4096):
    """relative_roi: (N, NUM_CO, 4) -> (N, NUM_CO, 4 * EMBED_DIM) float32."""
    N, NUM_CO = relative_roi.shape[:2]
    T = N * NUM_CO * 4  # total coordinate count (always a multiple of 4)

    # Small-input fast path: launch overhead swamps the work below ~4k coords.
    if T < min_pallas_coords:
        return _pos_enc_jax(relative_roi)

    # Pack two coordinates per 128-lane output row (lane-dense stores).
    R = T // 2
    coords2 = relative_roi.reshape(R, 2).astype(jnp.float32)

    # Sublane-aligned tile, no bigger than needed; ragged last block handles
    # any remainder (no wrapper-side pad / slice copies).
    tile = min(int(tile_rows), ((R + 7) // 8) * 8)
    tile = max(8, (tile // 8) * 8)
    grid = pl.cdiv(R, tile)

    hi, lo = _tables()

    out = pl.pallas_call(
        _pos_enc_kernel,
        out_shape=jax.ShapeDtypeStruct((R, OUT_W), jnp.float32),
        grid_spec=pltpu.PrefetchScalarGridSpec(
            num_scalar_prefetch=0,
            grid=(grid,),
            in_specs=[
                pl.BlockSpec((tile, PACK), lambda i: (i, 0)),
                pl.BlockSpec((OUT_W, OUT_W), lambda i: (0, 0)),   # table resident
                pl.BlockSpec((OUT_W, OUT_W), lambda i: (0, 0)),   # table resident
            ],
            out_specs=pl.BlockSpec((tile, OUT_W), lambda i: (i, 0)),
        ),
        # Single long row axis marked 'parallel' so v7x can split it across
        # its 2 TensorCores (no-op on single-core v5e/v6e).
        compiler_params=pltpu.CompilerParams(dimension_semantics=("parallel",)),
        cost_estimate=pl.CostEstimate(
            flops=2 * 2 * R * OUT_W * OUT_W,          # two (R,128)@(128,128) matmuls
            transcendentals=0,
            bytes_accessed=R * (PACK * 4 + OUT_W * 4) + 2 * OUT_W * OUT_W * 2,
        ),
    )(coords2, hi, lo)

    # (R, 128) row-major is bit-identical to (T, 64) row-major.
    return out.reshape(N, NUM_CO, 4 * EMBED_DIM)


if __name__ == "__main__":
    key = jax.random.PRNGKey(0)
    k_small, k_large = jax.random.split(key)

    # Small shape from the module's use-site; force the Pallas path.
    N, NUM_CO = 2, 3
    roi_small = jax.random.uniform(
        k_small, (N, NUM_CO, 4), minval=0.0, maxval=1024.0, dtype=jnp.float32
    )
    out_small = jax.block_until_ready(
        positional_encoding(roi_small, min_pallas_coords=0)
    )
    ref_small = _pos_enc_jax(roi_small)
    assert out_small.shape == (N, NUM_CO, 4 * EMBED_DIM), out_small.shape
    assert jnp.allclose(out_small, ref_small, atol=1e-5, rtol=1e-5), "small mismatch"

    # Larger coordinate stream: exercises multiple grid steps + ragged block.
    N2, NUM_CO2 = 128, 20  # T = 10240 coords -> 5120 packed rows -> grid of 3
    roi_large = jax.random.uniform(
        k_large, (N2, NUM_CO2, 4), minval=0.0, maxval=1024.0, dtype=jnp.float32
    )
    out_large = jax.block_until_ready(positional_encoding(roi_large))
    ref_large = _pos_enc_jax(roi_large)
    assert out_large.shape == (N2, NUM_CO2, 4 * EMBED_DIM), out_large.shape
    assert jnp.allclose(out_large, ref_large, atol=1e-5, rtol=1e-5), "large mismatch"

    print("KERNEL_OK")
</pallas_src>

<mosaic_0001>
module attributes {stable_mosaic.version = 11 : i64} {
  func.func @_pos_enc_kernel(%arg0: i32, %arg1: memref<16x2xf32, #tpu.memory_space<vmem>>, %arg2: memref<128x128xbf16, #tpu.memory_space<vmem>>, %arg3: memref<128x128xbf16, #tpu.memory_space<vmem>>, %arg4: memref<16x128xf32, #tpu.memory_space<vmem>>) attributes {dimension_semantics = [#tpu.dimension_semantics<parallel>], iteration_bounds = array<i64: 1>, scalar_prefetch = 0 : i64, scratch_operands = 0 : i64, tpu.core_type = #tpu.core_type<tc>, window_params = [{transform_indices = @transform_0, window_bounds = array<i64: 16, 2>}, {pipeline_mode = #tpu.pipeline_mode<synchronous>, transform_indices = @transform_1, window_bounds = array<i64: 128, 128>}, {pipeline_mode = #tpu.pipeline_mode<synchronous>, transform_indices = @transform_2, window_bounds = array<i64: 128, 128>}, {transform_indices = @transform_3, window_bounds = array<i64: 16, 128>}]} {
    %c0 = arith.constant 0 : index
    %c0_0 = arith.constant 0 : index
    %0 = vector.load %arg1[%c0, %c0_0] : memref<16x2xf32, #tpu.memory_space<vmem>>, vector<16x2xf32>
    %cst = arith.constant 6.250000e-02 : f32
    %1 = vector.broadcast %cst : f32 to vector<16x2xf32>
    %2 = arith.mulf %0, %1 : vector<16x2xf32>
    %3 = math.floor %2 : vector<16x2xf32>
    %cst_1 = arith.constant 0.000000e+00 : f32
    %cst_2 = arith.constant 6.300000e+01 : f32
    %4 = vector.broadcast %cst_1 : f32 to vector<16x2xf32>
    %5 = arith.maximumf %4, %3 : vector<16x2xf32>
    %6 = vector.broadcast %cst_2 : f32 to vector<16x2xf32>
    %7 = arith.minimumf %6, %5 : vector<16x2xf32>
    %8 = arith.fptosi %7 : vector<16x2xf32> to vector<16x2xi32>
    %9 = tpu.iota {dimensions = array<i32: 1>} : vector<16x128xi32>
    %10 = vector.extract_strided_slice %8 {offsets = [0, 0], sizes = [16, 1], strides = [1, 1]} : vector<16x2xi32> to vector<16x1xi32>
    %11 = vector.broadcast %10 : vector<16x1xi32> to vector<16x128xi32>
    %12 = arith.cmpi eq, %9, %11 : vector<16x128xi32>
    %13 = vector.extract_strided_slice %8 {offsets = [0, 1], sizes = [16, 1], strides = [1, 1]} : vector<16x2xi32> to vector<16x1xi32>
    %c64_i32 = arith.constant 64 : i32
    %14 = vector.broadcast %c64_i32 : i32 to vector<16x1xi32>
    %15 = arith.addi %13, %14 : vector<16x1xi32>
    %16 = vector.broadcast %15 : vector<16x1xi32> to vector<16x128xi32>
    %17 = arith.cmpi eq, %9, %16 : vector<16x128xi32>
    %18 = arith.ori %12, %17 : vector<16x128xi1>
    %cst_3 = arith.constant 1.000000e+00 : f32
    %cst_4 = arith.constant 0.000000e+00 : f32
    %19 = vector.broadcast %cst_3 : f32 to vector<16x128xf32>
    %20 = vector.broadcast %cst_4 : f32 to vector<16x128xf32>
    %21 = arith.select %18, %19, %20 : vector<16x128xi1>, vector<16x128xf32>
    %22 = arith.truncf %21 : vector<16x128xf32> to vector<16x128xbf16>
    %c0_5 = arith.constant 0 : index
    %c0_6 = arith.constant 0 : index
    %23 = vector.load %arg2[%c0_5, %c0_6] : memref<128x128xbf16, #tpu.memory_space<vmem>>, vector<128x128xbf16>
    %cst_7 = arith.constant dense<0.000000e+00> : vector<16x128xf32>
    %24 = tpu.matmul %22, %23, %cst_7 {dimension_numbers = #tpu.dot_dimension_numbers<[1], [0], [0], [1], [0, 0, 1, 1], [], []>} : vector<16x128xbf16>, vector<128x128xbf16>, vector<16x128xf32> -> vector<16x128xf32>
    %c0_8 = arith.constant 0 : index
    %c0_9 = arith.constant 0 : index
    %25 = vector.load %arg3[%c0_8, %c0_9] : memref<128x128xbf16, #tpu.memory_space<vmem>>, vector<128x128xbf16>
    %cst_10 = arith.constant dense<0.000000e+00> : vector<16x128xf32>
    %26 = tpu.matmul %22, %25, %cst_10 {dimension_numbers = #tpu.dot_dimension_numbers<[1], [0], [0], [1], [0, 0, 1, 1], [], []>} : vector<16x128xbf16>, vector<128x128xbf16>, vector<16x128xf32> -> vector<16x128xf32>
    %27 = arith.addf %24, %26 : vector<16x128xf32>
    %c0_11 = arith.constant 0 : index
    %c0_12 = arith.constant 0 : index
    %28 = vector.load %arg4[%c0_11, %c0_12] : memref<16x128xf32, #tpu.memory_space<vmem>>, vector<16x128xf32>
    tpu.vector_store %arg4[%c0_11, %c0_12], %27 {strides = array<i32>} : memref<16x128xf32, #tpu.memory_space<vmem>>, vector<16x128xf32>,
    return
  }
  func.func @transform_0(%arg0: i32) -> (i32, i32) {
    %c0_i32 = arith.constant 0 : i32
    %c0_i32_0 = arith.constant 0 : i32
    return %arg0, %c0_i32 : i32, i32
  }
  func.func @transform_1(%arg0: i32) -> (i32, i32) {
    %c0_i32 = arith.constant 0 : i32
    %c0_i32_0 = arith.constant 0 : i32
    %c0_i32_1 = arith.constant 0 : i32
    return %c0_i32, %c0_i32_0 : i32, i32
  }
  func.func @transform_2(%arg0: i32) -> (i32, i32) {
    %c0_i32 = arith.constant 0 : i32
    %c0_i32_0 = arith.constant 0 : i32
    %c0_i32_1 = arith.constant 0 : i32
    return %c0_i32, %c0_i32_0 : i32, i32
  }
  func.func @transform_3(%arg0: i32) -> (i32, i32) {
    %c0_i32 = arith.constant 0 : i32
    %c0_i32_0 = arith.constant 0 : i32
    return %arg0, %c0_i32 : i32, i32
  }
}

</mosaic_0001>

<bundles_post_ra>
// kernel: tpu_custom_call.1
= control target key start
LH: loop header
LB: loop body
LE: loop exit
PB: predicated region body
PF: predicated region fallthrough
CT: control target
= control target key end

     0   :  { %8 = vsyncpa [#allocation3], 0  ;;  %s590_s0 = inlined_call_operand.vmem [shape: f32[12,2], index: 0, kind: input, shape index: {}]   ;;  %s591_s1 = inlined_call_operand.hbm [shape: bf16[128,128], index: 1, kind: input, shape index: {}]   ;;  %s592_s2 = inlined_call_operand.hbm [shape: bf16[128,128], index: 2, kind: input, shape index: {}]   ;;  %s593_s3 = inlined_call_operand.hbm [shape: f32[12,128], index: 3, kind: output, shape index: {}]  }
   0x1   :  { %9 = vsyncpa [#allocation6], 0 }
   0x2   :  { %10 = vsyncpa [#allocation4], 0  ;;  %s498_s12 = smov [#allocation2]   ;;  %s426_s16 = scalar_lea.hbm %s591_s1, 1024 }
   0x3   :  { %s18_s13 = sshll.u32 %s498_s12, 4  ;;  %p427_p0 = scmp.ne.s32.totalorder %s591_s1, %s426_s16  ;;  %s19_s13 = int_to_ptr.vmem [resolvable:$true] %s18_s13 }
   0x4   :  { %p430_p1 = scmp.lt.u32.totalorder %s426_s16, %s591_s1 }
   0x6   :  { %p432_p2 = pnand %p430_p1, %p427_p0 }
   0x8   :  { %435 = shalt.err (!%p432_p2)
}
   0x9   :  { %s436_s21 = scalar_lea.vmem %s19_s13, 1024  ;;  %p441_p4 = scmp.lt.s32.totalorder %s19_s13, %s19_s13 }
   0xa   :  { %p437_p3 = scmp.ne.s32.totalorder %s19_s13, %s436_s21  ;;  %p442_p5 = scmp.lt.s32.totalorder %s436_s21, %s436_s21 }
   0xc   :  { %p443_p6 = por %p442_p5, %p441_p4 }
   0xe   :  { %p444_p7 = pnand %p443_p6, %p437_p3 }
  0x10   :  { %447 = shalt.err (!%p444_p7)
}
  0x11   :  { %s499_s22 = smov 64   ;;  %s500_s23 = smov 4  }
  0x12   :  { %24 = dma.hbm_to_vmem [thread:$0]  %s591_s1, 1024, %s19_s13, [#allocation3], %s499_s22, %s499_s22, %s500_s23  }
  0x13   :  { %s501_s26 = smov [#allocation5]   ;;  %s448_s30 = scalar_lea.hbm %s592_s2, 1024 }
  0x14   :  { %s30_s27 = sshll.u32 %s501_s26, 4  ;;  %p449_p8 = scmp.ne.s32.totalorder %s592_s2, %s448_s30  ;;  %s31_s27 = int_to_ptr.vmem [resolvable:$true] %s30_s27 }
  0x15   :  { %p452_p9 = scmp.lt.u32.totalorder %s448_s30, %s592_s2 }
  0x17   :  { %p454_p10 = pnand %p452_p9, %p449_p8 }
  0x19   :  { %457 = shalt.err (!%p454_p10)
}
  0x1a   :  { %s458_s8 = scalar_lea.vmem %s31_s27, 1024  ;;  %p463_p12 = scmp.lt.s32.totalorder %s31_s27, %s31_s27 }
  0x1b   :  { %p459_p11 = scmp.ne.s32.totalorder %s31_s27, %s458_s8  ;;  %p464_p13 = scmp.lt.s32.totalorder %s458_s8, %s458_s8 }
  0x1d   :  { %p465_p0 = por %p464_p13, %p463_p12 }
  0x1f   :  { %p466_p1 = pnand %p465_p0, %p459_p11 }
  0x21   :  { %469 = shalt.err (!%p466_p1)
}
  0x22   :  { %36 = dma.hbm_to_vmem [thread:$0]  %s592_s2, 1024, %s31_s27, [#allocation6], %s499_s22, %s499_s22, %s500_s23  }
  0x23   :  { %492 = dma.done.wait [#allocation3], 1024  }
  0x24   :  { %493 = vsyncadd [#allocation3], 4294966272 }
  0x25   :  { %494 = dma.done.wait [#allocation6], 1024  }
  0x26   :  { %495 = vsyncadd [#allocation6], 4294966272  ;;  %v502_v0 = vmov 0   ;;  %v503_v1 = vmov 1   ;;  %v504_v2 = vmov 0.0   ;;  %v44_v3 = vld [vmem:[%s590_s0] sm:$0xff]  ;;  %v56_v35 = vlaneseq }
  0x27   :  { %407 = vset.pattern.permute.xlu0 %v502_v0  ;;  %408 = vset.pattern.permute.xlu1 %v503_v1  ;;  %v45_v4 = vld [vmem:[%s590_s0 + $0x8] sm:$0xff]  ;;  %v46_v5 = vmul.f32 0.0625, %v44_v3  ;;  %v410_v7 = vld [vmem:[#allocation5] sm:$0xff]   ;;  %v412_v11 = vld [vmem:[#allocation5 + $0x8] sm:$0xff]   ;;  %vm505_vm0 = vmmov 0   ;;  %s507_s0 = smov [#allocation7]  }
  0x28   :  { %349 = vmatprep.subr.bf16.mxu1 %v504_v2  ;;  %369 = vmatprep.subr.bf16.mxu0 %v504_v2  ;;  %v47_v6 = vmul.f32 0.0625, %v45_v4  ;;  %v411_v8 = vld [vmem:[#allocation2] sm:$0xff]   ;;  %v413_v12 = vld [vmem:[#allocation2 + $0x8] sm:$0xff]   ;;  %v414_v17 = vld [vmem:[#allocation5 + $0x10] sm:$0xff]   ;;  %v57_v36 = vand.u32 127, %v56_v35  ;;  %s298_s2 = sshll.u32 %s507_s0, 4  ;;  %s299_s2 = int_to_ptr.vmem [resolvable:$true] %s298_s2 }
  0x29   :  { %v48_v9 = vfloor.f32 %v46_v5  ;;  %350 = vmatpush3.bf16.msra.mxu1 %v410_v7  ;;  %370 = vmatpush3.bf16.msra.mxu0 %v411_v8  ;;  %v415_v18 = vld [vmem:[#allocation2 + $0x10] sm:$0xff]   ;;  %v416_v23 = vld [vmem:[#allocation5 + $0x18] sm:$0xff]   ;;  %v418_v27 = vld [vmem:[#allocation5 + $0x20] sm:$0xff]   ;;  %v506_v41 = vmov 1.0|1.0   ;;  %s470_s14 = scalar_lea.vmem %s299_s2, 256  ;;  %p475_p3 = scmp.lt.s32.totalorder %s299_s2, %s299_s2 }
  0x2a   :  { %v49_v10 = vfloor.f32 %v47_v6  ;;  %351 = vmatprep.subr.bf16.mxu1 %v504_v2  ;;  %371 = vmatprep.subr.bf16.mxu0 %v504_v2  ;;  %v417_v24 = vld [vmem:[#allocation2 + $0x18] sm:$0xff]   ;;  %v419_v28 = vld [vmem:[#allocation2 + $0x20] sm:$0xff]   ;;  %v420_v29 = vld [vmem:[#allocation5 + $0x28] sm:$0xff]   ;;  %p471_p2 = scmp.ne.s32.totalorder %s299_s2, %s470_s14  ;;  %p476_p4 = scmp.lt.s32.totalorder %s470_s14, %s470_s14 }
  0x2b   :  { %v50_v13 = vmax.f32 %v48_v9, 0.0  ;;  %v421_v30 = vld [vmem:[#allocation2 + $0x28] sm:$0xff]   ;;  %365 = vmatprep.mubr.msk.bf16.mxu1 %vm505_vm0, %v504_v2  ;;  %385 = vmatprep.mubr.msk.bf16.mxu0 %vm505_vm0, %v504_v2  ;;  %v422_v31 = vld [vmem:[#allocation5 + $0x30] sm:$0xff]   ;;  %v424_v33 = vld [vmem:[#allocation5 + $0x38] sm:$0xff]  }
  0x2c   :  { %v51_v14 = vmax.f32 %v49_v10, 0.0  ;;  %v423_v32 = vld [vmem:[#allocation2 + $0x30] sm:$0xff]   ;;  %v425_v34 = vld [vmem:[#allocation2 + $0x38] sm:$0xff]   ;;  %p477_p5 = por %p476_p4, %p475_p3 }
  0x2d   :  { %v52_v15 = vmin.f32 %v50_v13, 63.0  ;;  %352 = vmatpush3.bf16.msra.mxu1 %v412_v11  ;;  %372 = vmatpush3.bf16.msra.mxu0 %v413_v12 }
  0x2e   :  { %v53_v16 = vmin.f32 %v51_v14, 63.0  ;;  %353 = vmatprep.subr.bf16.mxu1 %v504_v2  ;;  %373 = vmatprep.subr.bf16.mxu0 %v504_v2  ;;  %p478_p6 = pnand %p477_p5, %p471_p2 }
  0x2f   :  { %v391_v19 = vtrunc.f32 %v52_v15 }
  0x30   :  { %v393_v20 = vtrunc.f32 %v53_v16 }
  0x31   :  { %v392_v21 = vcvt.f32.s32 %v391_v19  ;;  %354 = vmatpush3.bf16.msra.mxu1 %v414_v17  ;;  %374 = vmatpush3.bf16.msra.mxu0 %v415_v18 }
  0x32   :  { %v394_v22 = vcvt.f32.s32 %v393_v20  ;;  %355 = vmatprep.subr.bf16.mxu1 %v504_v2  ;;  %375 = vmatprep.subr.bf16.mxu0 %v504_v2 }
  0x33   :  { %59 = vperm.xlu0 %407, %v392_v21   ;;  %v66_v25 = vadd.s32 64, %v392_v21 }
  0x34   :  { %v67_v26 = vadd.s32 64, %v394_v22 }
  0x35   :  { %69 = vperm.xlu1 %408, %v66_v25   ;;  %356 = vmatpush3.bf16.msra.mxu1 %v416_v23 }
  0x36   :  { %376 = vmatpush3.bf16.msra.mxu0 %v417_v24  ;;  %357 = vmatprep.subr.bf16.mxu1 %v504_v2 }
  0x37   :  { %62 = vperm.xlu0 %407, %v394_v22   ;;  %377 = vmatprep.subr.bf16.mxu0 %v504_v2 }
  0x39   :  { %72 = vperm.xlu1 %408, %v67_v26   ;;  %358 = vmatpush3.bf16.msra.mxu1 %v418_v27 }
  0x3a   :  { %378 = vmatpush3.bf16.msra.mxu0 %v419_v28  ;;  %359 = vmatprep.subr.bf16.mxu1 %v504_v2 }
  0x3b   :  { %379 = vmatprep.subr.bf16.mxu0 %v504_v2  ;;  %409 = vset.pattern.permute.xlu0 %v503_v1 }
  0x3d   :  { %360 = vmatpush3.bf16.msra.mxu1 %v420_v29 }
  0x3e   :  { %380 = vmatpush3.bf16.msra.mxu0 %v421_v30  ;;  %361 = vmatprep.subr.bf16.mxu1 %v504_v2 }
  0x3f   :  { %381 = vmatprep.subr.bf16.mxu0 %v504_v2 }
  0x41   :  { %362 = vmatpush3.bf16.msra.mxu1 %v422_v31 }
  0x42   :  { %382 = vmatpush3.bf16.msra.mxu0 %v423_v32  ;;  %363 = vmatprep.subr.bf16.mxu1 %v504_v2 }
  0x43   :  { %383 = vmatprep.subr.bf16.mxu0 %v504_v2 }
  0x45   :  { %364 = vmatpush3.bf16.msra.mxu1 %v424_v33 }
  0x46   :  { %384 = vmatpush3.bf16.msra.mxu0 %v425_v34 }
  0xb2   :  { %v60_v37 = vpop.permute.xlu0 %59 }
  0xb3   :  { %vm64_vm1 = vcmp.eq.s32.totalorder %v57_v36, %v60_v37 }
  0xb4   :  { %v70_v38 = vpop.permute.xlu1 %69 }
  0xb5   :  { %vm74_vm2 = vcmp.eq.s32.totalorder %v57_v36, %v70_v38 }
  0xb6   :  { %v63_v39 = vpop.permute.xlu0 %62  ;;  %vm76_vm3 = vmor %vm64_vm1, %vm74_vm2 }
  0xb7   :  { %vm65_vm4 = vcmp.eq.s32.totalorder %v57_v36, %v63_v39 }
  0xb8   :  { %v73_v40 = vpop.permute.xlu1 %72 }
  0xb9   :  { %vm75_vm5 = vcmp.eq.s32.totalorder %v57_v36, %v73_v40 }
  0xba   :  { %vm77_vm6 = vmor %vm65_vm4, %vm75_vm5 }
  0xbb   :  { %vm319_vm7 = vmpackc.low %vm77_vm6, %vm76_vm3 }
  0xbc   :  { %366 = vmatmul.mubr.msk.bf16.vlgmr.msra.gmra.mrb[0].mxu1 %vm319_vm7, %v506_v41  ;;  %386 = vmatmul.mubr.msk.bf16.vlgmr.msra.gmra.mrb[0].mxu0 %vm319_vm7, %v506_v41 }
 0x18f   :  { %v195_v42 = vpop.f32.mrb[0].mxu1  ;;  %v284_v43 = vpop.f32.mrb[0].mxu0 }
 0x190   :  { %v285_v44 = vadd.f32 %v284_v43, %v195_v42  ;;  %v367_v45 = vpop.f32.mrb[1].mxu1  ;;  %v387_v46 = vpop.f32.mrb[1].mxu0 }
 0x191   :  { %v198_v47 = vpop.f32.mrb[2].mxu1  ;;  %v287_v48 = vpop.f32.mrb[2].mxu0 }
 0x192   :  { %291 = vst [vmem:[#allocation7] sm:$0xff] %v285_v44  ;;  %v288_v49 = vadd.f32 %v287_v48, %v198_v47  ;;  %v368_v50 = vpop.f32.mrb[3].mxu1  ;;  %v388_v51 = vpop.f32.mrb[3].mxu0 }
 0x194   :  { %292 = vst [vmem:[#allocation7 + $0x8] sm:$0xff] %v288_v49 }
 0x195   :  { %481 = shalt.err (!%p478_p6)
}
 0x196   :  { %s482_s17 = scalar_lea.hbm %s593_s3, 256 }
 0x197   :  { %p483_p7 = scmp.ne.s32.totalorder %s593_s3, %s482_s17  ;;  %p486_p8 = scmp.lt.u32.totalorder %s482_s17, %s593_s3 }
 0x199   :  { %p488_p9 = pnand %p486_p8, %p483_p7 }
 0x19b   :  { %491 = shalt.err (!%p488_p9)
}
 0x19c   :  { %s508_s22 = smov 128   ;;  %s509_s23 = smov 8  }
 0x19d   :  { %304 = dma.vmem_to_hbm [thread:$0]  %s299_s2, 256, %s593_s3, [#allocation4], %s508_s22, %s508_s22, %s509_s23  }
 0x19e   :  { %496 = dma.done.wait [#allocation4], 256  }
 0x19f   :  { %497 = vsyncadd [#allocation4], 4294967040 }
 0x1a0   :  { %308 = vsyncpa [#allocation3], 1 }
 0x1a1   :  { %309 = vsyncpa [#allocation6], 1 }
 0x1a2   :  { %310 = vsyncpa [#allocation4], 1 }

</bundles_post_ra>
